<compile_context>
chip_gen: v7x
topology: tpu7x:2x2x1
jax: 0.10.0
libtpu: 0.0.40
codegen_flags: <defaults>
</compile_context>

<pallas_src>
import math
import functools

import numpy as np
import jax
import jax.numpy as jnp
from jax.experimental import pallas as pl
from jax.experimental.pallas import tpu as pltpu


def _round_up(x, m):
    return ((x + m - 1) // m) * m


def _ffl_block_kernel(pred_ref, targ_ref, mcat_ref, out_ref, *,
                      k, alpha, log_matrix):
    """One grid step: TB flattened slices -> partial sum of weight * freq_dist."""
    # Difference rows (TB, K) in bf16.  DFT is linear, so DFT(x) - DFT(y) ==
    # DFT(x - y): one matmul instead of two.
    d = pred_ref[...] - targ_ref[...]

    # 2-D ortho DFT of every row via one dense matmul against the Kronecker
    # DFT matrix [Re(M) | Im(M)]  ->  (TB, 2K) with f32 accumulation.
    f = jnp.dot(d, mcat_ref[...], preferred_element_type=jnp.float32)
    fr = f[:, :k]
    fi = f[:, k:]

    dist = fr * fr + fi * fi                     # freq distance, (TB, K) f32

    w = jnp.sqrt(dist)
    if alpha != 1.0:
        # 0 ** alpha stays 0 for alpha > 0: log(0) = -inf -> exp(-inf) = 0.
        w = jnp.exp(jnp.float32(alpha) * jnp.log(w))
    if log_matrix:
        w = jnp.log(w + 1.0)

    # batch_matrix=False semantics: normalize each slice (row) by its own max.
    mx = jnp.max(w, axis=-1, keepdims=True)                  # (TB, 1)
    w = w * pl.reciprocal(mx, approx=True)
    w = jnp.where(jnp.isnan(w), 0.0, w)
    w = jnp.clip(w, 0.0, 1.0)

    partial = jnp.sum(w * dist)
    # Broadcast the scalar partial over a full (8, 128) tile -> unmasked store,
    # and every grid step writes a disjoint output block (safe for "parallel").
    out_ref[...] = jnp.full((8, 128), partial, dtype=jnp.float32)


def focal_frequency_loss(pred, target, *, loss_weight=1.0, alpha=1.0,
                         patch_factor=1, ave_spectrum=False, log_matrix=False,
                         batch_matrix=False, block_rows=128):
    """JAX/Pallas equivalent of FocalFrequencyLoss.forward(pred, target)."""
    # TODO(synk): `matrix is not None` path (externally supplied weight matrix)
    #             and batch_matrix=True (global-max normalization) not implemented.
    assert not batch_matrix, "batch_matrix=True not supported in this kernel"

    N, C, H, W = pred.shape
    pf = int(patch_factor)
    assert H % pf == 0 and W % pf == 0, "patch_factor must divide H and W"
    ph, pw = H // pf, W // pf
    K = ph * pw
    if K > 1024:
        # TODO(synk): large patches (ph*pw > 1024) need a separable row/col DFT
        #             kernel; the dense Kronecker DFT matrix would not fit in VMEM.
        raise NotImplementedError("focal_frequency_loss kernel supports ph*pw <= 1024")

    def to_patches(x):
        # matches torch: patches stacked at dim 1, row-major over (i, j)
        x = x.reshape(N, C, pf, ph, pf, pw).transpose(0, 2, 4, 1, 3, 5)
        return x.reshape(N, pf * pf, C, ph, pw)

    p = to_patches(pred.astype(jnp.float32))
    t = to_patches(target.astype(jnp.float32))

    if ave_spectrum:
        # FFT is linear, so the minibatch-average of the spectrum equals the
        # spectrum of the minibatch-average image.
        p = jnp.mean(p, axis=0, keepdims=True)
        t = jnp.mean(t, axis=0, keepdims=True)

    n_eff = p.shape[0]
    B = n_eff * pf * pf * C
    p_rows = p.reshape(B, K).astype(jnp.bfloat16)
    t_rows = t.reshape(B, K).astype(jnp.bfloat16)

    # Block / grid sizing (TB multiple of 16 for bf16 sublane packing).
    TB = _round_up(min(int(block_rows), max(B, 1)), 16)
    Bp = _round_up(B, TB)
    nblk = Bp // TB
    if Bp != B:
        padding = ((0, Bp - B), (0, 0))
        p_rows = jnp.pad(p_rows, padding)     # zero rows contribute 0 to the sum
        t_rows = jnp.pad(t_rows, padding)

    # Orthonormal 2-D DFT as a single real (K, 2K) matrix:
    #   vec(Dh @ Z @ Dw) = kron(Dh, Dw) @ vec(Z)   (row-major vec; Dh, Dw symmetric)
    kh = np.arange(ph)
    dh = np.exp(-2j * np.pi * np.outer(kh, kh) / ph) / math.sqrt(ph)
    kw = np.arange(pw)
    dw = np.exp(-2j * np.pi * np.outer(kw, kw) / pw) / math.sqrt(pw)
    m = np.kron(dh, dw)                                    # (K, K), symmetric
    m_cat = np.concatenate([m.real, m.imag], axis=1)       # (K, 2K)
    m_cat = jnp.asarray(m_cat, jnp.bfloat16)

    kernel = functools.partial(_ffl_block_kernel, k=K, alpha=float(alpha),
                               log_matrix=bool(log_matrix))

    partials = pl.pallas_call(
        kernel,
        out_shape=jax.ShapeDtypeStruct((nblk * 8, 128), jnp.float32),
        grid=(nblk,),
        in_specs=[
            pl.BlockSpec((TB, K), lambda b: (b, 0)),        # pred rows (bf16)
            pl.BlockSpec((TB, K), lambda b: (b, 0)),        # target rows (bf16)
            pl.BlockSpec((K, 2 * K), lambda b: (0, 0)),     # DFT matrix [Re | Im]
        ],
        out_specs=pl.BlockSpec((8, 128), lambda b: (b, 0)),
        compiler_params=pltpu.CompilerParams(
            dimension_semantics=("parallel",)),
    )(p_rows, t_rows, m_cat)

    acc = jnp.sum(partials.reshape(nblk, 8, 128)[:, 0, 0])  # one value per block
    loss = acc / jnp.float32(B * ph * pw)
    return loss * jnp.float32(loss_weight)


def _reference_loss_np(pred, target):
    """float64 numpy reference for the default config (patch_factor=1, alpha=1)."""
    p = np.asarray(pred, np.float64)[:, None]      # (N, 1, C, H, W)
    t = np.asarray(target, np.float64)[:, None]
    fp = np.fft.fft2(p, norm="ortho")
    ft = np.fft.fft2(t, norm="ortho")
    d = fp - ft
    dist = d.real ** 2 + d.imag ** 2
    w = np.sqrt(dist)
    mx = w.max(axis=(-1, -2), keepdims=True)
    with np.errstate(invalid="ignore", divide="ignore"):
        w = w / mx
    w = np.nan_to_num(w, nan=0.0)
    w = np.clip(w, 0.0, 1.0)
    return float(np.mean(w * dist))


if __name__ == "__main__":
    key = jax.random.PRNGKey(0)
    k1, k2 = jax.random.split(key)
    pred = jax.random.normal(k1, (2, 4, 16, 16), dtype=jnp.float32)
    target = jax.random.normal(k2, (2, 4, 16, 16), dtype=jnp.float32)

    loss = focal_frequency_loss(pred, target)
    loss = jax.block_until_ready(loss)

    ref = _reference_loss_np(np.asarray(pred), np.asarray(target))
    np.testing.assert_allclose(float(loss), ref, rtol=1e-2, atol=1e-4)
    print("KERNEL_OK")
</pallas_src>

<mosaic_0001>
module attributes {stable_mosaic.version = 11 : i64} {
  func.func @_ffl_block_kernel(%arg0: i32, %arg1: memref<16x256xbf16, #tpu.memory_space<vmem>>, %arg2: memref<16x256xbf16, #tpu.memory_space<vmem>>, %arg3: memref<256x512xbf16, #tpu.memory_space<vmem>>, %arg4: memref<8x128xf32, #tpu.memory_space<vmem>>) attributes {dimension_semantics = [#tpu.dimension_semantics<parallel>], iteration_bounds = array<i64: 1>, scalar_prefetch = 0 : i64, scratch_operands = 0 : i64, tpu.core_type = #tpu.core_type<tc>, window_params = [{transform_indices = @transform_0, window_bounds = array<i64: 16, 256>}, {transform_indices = @transform_1, window_bounds = array<i64: 16, 256>}, {pipeline_mode = #tpu.pipeline_mode<synchronous>, transform_indices = @transform_2, window_bounds = array<i64: 256, 512>}, {transform_indices = @transform_3, window_bounds = array<i64: 8, 128>}]} {
    %c0 = arith.constant 0 : index
    %c0_0 = arith.constant 0 : index
    %0 = vector.load %arg1[%c0, %c0_0] : memref<16x256xbf16, #tpu.memory_space<vmem>>, vector<16x256xbf16>
    %c0_1 = arith.constant 0 : index
    %c0_2 = arith.constant 0 : index
    %1 = vector.load %arg2[%c0_1, %c0_2] : memref<16x256xbf16, #tpu.memory_space<vmem>>, vector<16x256xbf16>
    %2 = arith.subf %0, %1 : vector<16x256xbf16>
    %c0_3 = arith.constant 0 : index
    %c0_4 = arith.constant 0 : index
    %3 = vector.load %arg3[%c0_3, %c0_4] : memref<256x512xbf16, #tpu.memory_space<vmem>>, vector<256x512xbf16>
    %cst = arith.constant dense<0.000000e+00> : vector<16x512xf32>
    %4 = tpu.matmul %2, %3, %cst {dimension_numbers = #tpu.dot_dimension_numbers<[1], [0], [0], [1], [0, 0, 1, 1], [], []>} : vector<16x256xbf16>, vector<256x512xbf16>, vector<16x512xf32> -> vector<16x512xf32>
    %5 = vector.extract_strided_slice %4 {offsets = [0, 0], sizes = [16, 256], strides = [1, 1]} : vector<16x512xf32> to vector<16x256xf32>
    %6 = vector.extract_strided_slice %4 {offsets = [0, 256], sizes = [16, 256], strides = [1, 1]} : vector<16x512xf32> to vector<16x256xf32>
    %7 = arith.mulf %5, %5 : vector<16x256xf32>
    %8 = arith.mulf %6, %6 : vector<16x256xf32>
    %9 = arith.addf %7, %8 : vector<16x256xf32>
    %10 = math.sqrt %9 : vector<16x256xf32>
    %cst_5 = arith.constant dense<0xFF800000> : vector<16xf32>
    %11 = vector.multi_reduction <maximumf>, %10, %cst_5 [1] : vector<16x256xf32> to vector<16xf32>
    %12 = vector.shape_cast %11 : vector<16xf32> to vector<16x1xf32>
    %13 = tpu.reciprocal %12 {approx = true} : vector<16x1xf32> -> vector<16x1xf32>
    %14 = vector.broadcast %13 : vector<16x1xf32> to vector<16x256xf32>
    %15 = arith.mulf %10, %14 : vector<16x256xf32>
    %16 = arith.cmpf one, %15, %15 : vector<16x256xf32>
    %cst_6 = arith.constant 0.000000e+00 : f32
    %17 = vector.broadcast %cst_6 : f32 to vector<16x256xf32>
    %18 = arith.select %16, %17, %15 : vector<16x256xi1>, vector<16x256xf32>
    %cst_7 = arith.constant 0.000000e+00 : f32
    %cst_8 = arith.constant 1.000000e+00 : f32
    %19 = vector.broadcast %cst_7 : f32 to vector<16x256xf32>
    %20 = arith.maximumf %19, %18 : vector<16x256xf32>
    %21 = vector.broadcast %cst_8 : f32 to vector<16x256xf32>
    %22 = arith.minimumf %21, %20 : vector<16x256xf32>
    %23 = arith.mulf %22, %9 : vector<16x256xf32>
    %24 = vector.shape_cast %23 : vector<16x256xf32> to vector<1x16x256xf32>
    %cst_9 = arith.constant dense<0.000000e+00> : vector<1xf32>
    %25 = vector.multi_reduction <add>, %24, %cst_9 [1, 2] : vector<1x16x256xf32> to vector<1xf32>
    %26 = vector.shape_cast %25 : vector<1xf32> to vector<1x1x1xf32>
    %27 = vector.extract %26[0, 0, 0] : f32 from vector<1x1x1xf32>
    %28 = vector.broadcast %27 : f32 to vector<8x128xf32>
    %c0_10 = arith.constant 0 : index
    %c0_11 = arith.constant 0 : index
    %29 = vector.load %arg4[%c0_10, %c0_11] : memref<8x128xf32, #tpu.memory_space<vmem>>, vector<8x128xf32>
    tpu.vector_store %arg4[%c0_10, %c0_11], %28 {strides = array<i32>} : memref<8x128xf32, #tpu.memory_space<vmem>>, vector<8x128xf32>,
    return
  }
  func.func @transform_0(%arg0: i32) -> (i32, i32) {
    %c0_i32 = arith.constant 0 : i32
    %c0_i32_0 = arith.constant 0 : i32
    return %arg0, %c0_i32 : i32, i32
  }
  func.func @transform_1(%arg0: i32) -> (i32, i32) {
    %c0_i32 = arith.constant 0 : i32
    %c0_i32_0 = arith.constant 0 : i32
    return %arg0, %c0_i32 : i32, i32
  }
  func.func @transform_2(%arg0: i32) -> (i32, i32) {
    %c0_i32 = arith.constant 0 : i32
    %c0_i32_0 = arith.constant 0 : i32
    %c0_i32_1 = arith.constant 0 : i32
    return %c0_i32, %c0_i32_0 : i32, i32
  }
  func.func @transform_3(%arg0: i32) -> (i32, i32) {
    %c0_i32 = arith.constant 0 : i32
    %c0_i32_0 = arith.constant 0 : i32
    return %arg0, %c0_i32 : i32, i32
  }
}

</mosaic_0001>

<bundles_post_ra>
// kernel: tpu_custom_call.1
= control target key start
LH: loop header
LB: loop body
LE: loop exit
PB: predicated region body
PF: predicated region fallthrough
CT: control target
= control target key end

     0   :  { %8 = vsyncpa [#allocation3], 0  ;;  %s1041_s0 = inlined_call_operand.hbm [shape: bf16[16,256], index: 0, kind: input, shape index: {}]   ;;  %s1042_s1 = inlined_call_operand.hbm [shape: bf16[16,256], index: 1, kind: input, shape index: {}]   ;;  %s1043_s2 = inlined_call_operand.hbm [shape: bf16[256,512], index: 2, kind: input, shape index: {}]   ;;  %s1044_s3 = inlined_call_operand.hbm [shape: f32[8,128], index: 3, kind: output, shape index: {}]  }
   0x1   :  { %9 = vsyncpa [#allocation6], 0 }
   0x2   :  { %10 = vsyncpa [#allocation4], 0  ;;  %s922_s12 = smov [#allocation5]   ;;  %s923_s14 = smov [#allocation2]  }
   0x3   :  { %s28_s13 = sshll.u32 %s922_s12, 4  ;;  %s16_s15 = sshll.u32 %s923_s14, 4  ;;  %s29_s13 = int_to_ptr.vmem [resolvable:$true] %s28_s13  ;;  %s950_s15 = int_to_ptr.vmem [resolvable:$true] %s16_s15 }
   0x4   :  { %s828_s18 = scalar_lea.hbm %s1042_s1, 256 }
   0x5   :  { %p829_p0 = scmp.ne.s32.totalorder %s1042_s1, %s828_s18  ;;  %p832_p1 = scmp.lt.u32.totalorder %s828_s18, %s1042_s1 }
   0x7   :  { %p834_p2 = pnand %p832_p1, %p829_p0 }
   0x9   :  { %837 = shalt.err (!%p834_p2)
}
   0xa   :  { %s838_s23 = scalar_lea.vmem %s29_s13, 256  ;;  %p843_p4 = scmp.lt.s32.totalorder %s29_s13, %s29_s13 }
   0xb   :  { %p839_p3 = scmp.ne.s32.totalorder %s29_s13, %s838_s23  ;;  %p844_p5 = scmp.lt.s32.totalorder %s838_s23, %s838_s23 }
   0xd   :  { %p845_p6 = por %p844_p5, %p843_p4 }
   0xf   :  { %p846_p7 = pnand %p845_p6, %p839_p3 }
  0x11   :  { %849 = shalt.err (!%p846_p7)
}
  0x12   :  { %s924_s24 = smov 128   ;;  %s925_s25 = smov 8  }
  0x13   :  { %34 = dma.hbm_to_vmem [thread:$0]  %s1042_s1, 256, %s29_s13, [#allocation6], %s924_s24, %s924_s24, %s925_s25  }
  0x14   :  { %s850_s30 = scalar_lea.hbm %s1041_s0, 256 }
  0x15   :  { %p851_p8 = scmp.ne.s32.totalorder %s1041_s0, %s850_s30  ;;  %p854_p9 = scmp.lt.u32.totalorder %s850_s30, %s1041_s0 }
  0x17   :  { %p856_p10 = pnand %p854_p9, %p851_p8 }
  0x19   :  { %859 = shalt.err (!%p856_p10)
}
  0x1a   :  { %s860_s8 = scalar_lea.vmem %s950_s15, 256  ;;  %p865_p12 = scmp.lt.s32.totalorder %s950_s15, %s950_s15 }
  0x1b   :  { %p861_p11 = scmp.ne.s32.totalorder %s950_s15, %s860_s8  ;;  %p866_p13 = scmp.lt.s32.totalorder %s860_s8, %s860_s8 }
  0x1d   :  { %p867_p0 = por %p866_p13, %p865_p12 }
  0x1f   :  { %p868_p1 = pnand %p867_p0, %p861_p11 }
  0x21   :  { %871 = shalt.err (!%p868_p1)
}
  0x22   :  { %22 = dma.hbm_to_vmem [thread:$0]  %s1041_s0, 256, %s950_s15, [#allocation3], %s924_s24, %s924_s24, %s925_s25  }
  0x23   :  { %s926_s10 = smov [#allocation7]   ;;  %s872_s14 = scalar_lea.hbm %s1043_s2, 8192 }
  0x24   :  { %s40_s11 = sshll.u32 %s926_s10, 4  ;;  %p873_p2 = scmp.ne.s32.totalorder %s1043_s2, %s872_s14  ;;  %s41_s11 = int_to_ptr.vmem [resolvable:$true] %s40_s11 }
  0x25   :  { %p876_p3 = scmp.lt.u32.totalorder %s872_s14, %s1043_s2 }
  0x27   :  { %p878_p4 = pnand %p876_p3, %p873_p2 }
  0x29   :  { %881 = shalt.err (!%p878_p4)
}
  0x2a   :  { %s882_s20 = scalar_lea.vmem %s41_s11, 8192  ;;  %p887_p6 = scmp.lt.s32.totalorder %s41_s11, %s41_s11 }
  0x2b   :  { %p883_p5 = scmp.ne.s32.totalorder %s41_s11, %s882_s20  ;;  %p888_p7 = scmp.lt.s32.totalorder %s882_s20, %s882_s20 }
  0x2d   :  { %p889_p8 = por %p888_p7, %p887_p6 }
  0x2f   :  { %p890_p9 = pnand %p889_p8, %p883_p5 }
  0x31   :  { %893 = shalt.err (!%p890_p9)
}
  0x32   :  { %s927_s0 = smov 256   ;;  %s928_s15 = smov 16  }
  0x33   :  { %46 = dma.hbm_to_vmem [thread:$0]  %s1043_s2, 8192, %s41_s11, [#allocation6], %s927_s0, %s927_s0, %s928_s15  }
  0x34   :  { %916 = dma.done.wait [#allocation3], 256  }
  0x35   :  { %917 = vsyncadd [#allocation3], 4294967040 }
  0x36   :  { %918 = dma.done.wait [#allocation6], 8448  }
  0x37   :  { %919 = vsyncadd [#allocation6], 4294958848  ;;  %v720_v0 = vld [vmem:[#allocation7 + $0x4] ss:$16 sps:$4 sm:$0xff]   ;;  %v722_v1 = vld [vmem:[#allocation7 + $0xc] ss:$16 sps:$4 sm:$0xff]  }
  0x38   :  { %456 = vmatprep.subr.bf16.mxu0 %v720_v0  ;;  %v724_v2 = vld [vmem:[#allocation7] ss:$16 sps:$4 sm:$0xff]   ;;  %v725_v3 = vld [vmem:[#allocation7 + $0x8] ss:$16 sps:$4 sm:$0xff]   ;;  %499 = vmatprep.subr.bf16.mxu1 %v722_v1  ;;  %v726_v4 = vld [vmem:[#allocation7 + $0x24] ss:$16 sps:$4 sm:$0xff]  }
  0x39   :  { %457 = vmatpush1.bf16.msra.mxu0 %v724_v2  ;;  %500 = vmatpush1.bf16.msra.mxu1 %v725_v3  ;;  %v728_v5 = vld [vmem:[#allocation7 + $0x2c] ss:$16 sps:$4 sm:$0xff]   ;;  %v730_v6 = vld [vmem:[#allocation7 + $0x20] ss:$16 sps:$4 sm:$0xff]   ;;  %v731_v7 = vld [vmem:[#allocation7 + $0x28] ss:$16 sps:$4 sm:$0xff]  }
  0x3a   :  { %458 = vmatprep.subr.bf16.mxu0 %v726_v4  ;;  %501 = vmatprep.subr.bf16.mxu1 %v728_v5  ;;  %v732_v8 = vld [vmem:[#allocation7 + $0x44] ss:$16 sps:$4 sm:$0xff]   ;;  %v734_v9 = vld [vmem:[#allocation7 + $0x4c] ss:$16 sps:$4 sm:$0xff]   ;;  %v736_v10 = vld [vmem:[#allocation7 + $0x40] ss:$16 sps:$4 sm:$0xff]  }
  0x3b   :  { %v737_v11 = vld [vmem:[#allocation7 + $0x48] ss:$16 sps:$4 sm:$0xff]   ;;  %v738_v12 = vld [vmem:[#allocation7 + $0x64] ss:$16 sps:$4 sm:$0xff]   ;;  %v740_v13 = vld [vmem:[#allocation7 + $0x6c] ss:$16 sps:$4 sm:$0xff]  }
  0x3c   :  { %v742_v14 = vld [vmem:[#allocation7 + $0x60] ss:$16 sps:$4 sm:$0xff]   ;;  %v743_v15 = vld [vmem:[#allocation7 + $0x68] ss:$16 sps:$4 sm:$0xff]   ;;  %v744_v16 = vld [vmem:[#allocation7 + $0x84] ss:$16 sps:$4 sm:$0xff]  }
  0x3d   :  { %459 = vmatpush1.bf16.msra.mxu0 %v730_v6  ;;  %502 = vmatpush1.bf16.msra.mxu1 %v731_v7  ;;  %v746_v17 = vld [vmem:[#allocation7 + $0x8c] ss:$16 sps:$4 sm:$0xff]   ;;  %v748_v18 = vld [vmem:[#allocation7 + $0x80] ss:$16 sps:$4 sm:$0xff]   ;;  %v749_v19 = vld [vmem:[#allocation7 + $0x88] ss:$16 sps:$4 sm:$0xff]  }
  0x3e   :  { %460 = vmatprep.subr.bf16.mxu0 %v732_v8  ;;  %503 = vmatprep.subr.bf16.mxu1 %v734_v9  ;;  %v750_v20 = vld [vmem:[#allocation7 + $0xa4] ss:$16 sps:$4 sm:$0xff]   ;;  %v752_v21 = vld [vmem:[#allocation7 + $0xac] ss:$16 sps:$4 sm:$0xff]   ;;  %v754_v22 = vld [vmem:[#allocation7 + $0xa0] ss:$16 sps:$4 sm:$0xff]  }
  0x3f   :  { %v755_v23 = vld [vmem:[#allocation7 + $0xa8] ss:$16 sps:$4 sm:$0xff]   ;;  %v756_v24 = vld [vmem:[#allocation7 + $0xc4] ss:$16 sps:$4 sm:$0xff]   ;;  %v758_v25 = vld [vmem:[#allocation7 + $0xcc] ss:$16 sps:$4 sm:$0xff]  }
  0x40   :  { %v760_v26 = vld [vmem:[#allocation7 + $0xc0] ss:$16 sps:$4 sm:$0xff]   ;;  %v761_v27 = vld [vmem:[#allocation7 + $0xc8] ss:$16 sps:$4 sm:$0xff]   ;;  %v762_v28 = vld [vmem:[#allocation7 + $0xe4] ss:$16 sps:$4 sm:$0xff]  }
  0x41   :  { %461 = vmatpush1.bf16.msra.mxu0 %v736_v10  ;;  %504 = vmatpush1.bf16.msra.mxu1 %v737_v11  ;;  %v764_v29 = vld [vmem:[#allocation7 + $0xec] ss:$16 sps:$4 sm:$0xff]   ;;  %v766_v30 = vld [vmem:[#allocation7 + $0xe0] ss:$16 sps:$4 sm:$0xff]   ;;  %v767_v31 = vld [vmem:[#allocation7 + $0xe8] ss:$16 sps:$4 sm:$0xff]  }
  0x42   :  { %462 = vmatprep.subr.bf16.mxu0 %v738_v12  ;;  %505 = vmatprep.subr.bf16.mxu1 %v740_v13  ;;  %v768_v32 = vld [vmem:[#allocation7 + $0x104] ss:$16 sps:$4 sm:$0xff]   ;;  %v770_v33 = vld [vmem:[#allocation7 + $0x10c] ss:$16 sps:$4 sm:$0xff]   ;;  %v772_v34 = vld [vmem:[#allocation7 + $0x100] ss:$16 sps:$4 sm:$0xff]  }
  0x43   :  { %v773_v35 = vld [vmem:[#allocation7 + $0x108] ss:$16 sps:$4 sm:$0xff]   ;;  %v774_v36 = vld [vmem:[#allocation7 + $0x124] ss:$16 sps:$4 sm:$0xff]   ;;  %v776_v37 = vld [vmem:[#allocation7 + $0x12c] ss:$16 sps:$4 sm:$0xff]  }
  0x44   :  { %v778_v38 = vld [vmem:[#allocation7 + $0x120] ss:$16 sps:$4 sm:$0xff]   ;;  %v779_v39 = vld [vmem:[#allocation7 + $0x128] ss:$16 sps:$4 sm:$0xff]   ;;  %v780_v40 = vld [vmem:[#allocation7 + $0x144] ss:$16 sps:$4 sm:$0xff]  }
  0x45   :  { %463 = vmatpush1.bf16.msra.mxu0 %v742_v14  ;;  %506 = vmatpush1.bf16.msra.mxu1 %v743_v15  ;;  %v782_v41 = vld [vmem:[#allocation7 + $0x14c] ss:$16 sps:$4 sm:$0xff]   ;;  %v784_v42 = vld [vmem:[#allocation7 + $0x140] ss:$16 sps:$4 sm:$0xff]   ;;  %v785_v43 = vld [vmem:[#allocation7 + $0x148] ss:$16 sps:$4 sm:$0xff]  }
  0x46   :  { %464 = vmatprep.subr.bf16.mxu0 %v744_v16  ;;  %507 = vmatprep.subr.bf16.mxu1 %v746_v17  ;;  %v786_v44 = vld [vmem:[#allocation7 + $0x164] ss:$16 sps:$4 sm:$0xff]   ;;  %v788_v45 = vld [vmem:[#allocation7 + $0x16c] ss:$16 sps:$4 sm:$0xff]   ;;  %v790_v50 = vld [vmem:[#allocation7 + $0x160] ss:$16 sps:$4 sm:$0xff]  }
  0x47   :  { %v56_v46 = vld [vmem:[#allocation2] sm:$0xff]  ;;  %v57_v47 = vld [vmem:[#allocation2 + $0x8] sm:$0xff]  ;;  %v58_v48 = vld [vmem:[#allocation5] sm:$0xff]  ;;  %s929_s2 = smov [#allocation8]  }
  0x48   :  { %v59_v49 = vld [vmem:[#allocation5 + $0x8] sm:$0xff]  ;;  %v60_v52 = vsub.bf16 %v56_v46, %v58_v48  ;;  %v792_v54 = vld [vmem:[#allocation7 + $0x184] ss:$16 sps:$4 sm:$0xff]   ;;  %v796_v57 = vld [vmem:[#allocation7 + $0x180] ss:$16 sps:$4 sm:$0xff]   ;;  %s634_s23 = sshll.u32 %s929_s2, 4  ;;  %s635_s23 = int_to_ptr.vmem [resolvable:$true] %s634_s23 }
  0x49   :  { %465 = vmatpush1.bf16.msra.mxu0 %v748_v18  ;;  %508 = vmatpush1.bf16.msra.mxu1 %v749_v19  ;;  %v791_v51 = vld [vmem:[#allocation7 + $0x168] ss:$16 sps:$4 sm:$0xff]   ;;  %v61_v53 = vsub.bf16 %v57_v47, %v59_v49  ;;  %v794_v55 = vld [vmem:[#allocation7 + $0x18c] ss:$16 sps:$4 sm:$0xff]   ;;  %v798_v59 = vld [vmem:[#allocation7 + $0x1a4] ss:$16 sps:$4 sm:$0xff]   ;;  %p899_p11 = scmp.lt.s32.totalorder %s635_s23, %s635_s23 }
  0x4a   :  { %466 = vmatprep.subr.bf16.mxu0 %v750_v20  ;;  %509 = vmatprep.subr.bf16.mxu1 %v752_v21  ;;  %v797_v58 = vld [vmem:[#allocation7 + $0x188] ss:$16 sps:$4 sm:$0xff]   ;;  %v800_v60 = vld [vmem:[#allocation7 + $0x1ac] ss:$16 sps:$4 sm:$0xff]   ;;  %v802_v61 = vld [vmem:[#allocation7 + $0x1a0] ss:$16 sps:$4 sm:$0xff]  }
  0x4b   :  { %v645_v56 = vcombine.high %v60_v52, %v61_v53  ;;  %v803_v62 = vld [vmem:[#allocation7 + $0x1a8] ss:$16 sps:$4 sm:$0xff]   ;;  %v804_v63 = vld [vmem:[#allocation7 + $0x1c4] ss:$16 sps:$4 sm:$0xff]   ;;  %v806_v0 = vld [vmem:[#allocation7 + $0x1cc] ss:$16 sps:$4 sm:$0xff]   ;;  %v644_v7 = vcombine.low %v60_v52, %v61_v53 }
  0x4c   :  { %v808_v1 = vld [vmem:[#allocation7 + $0x1c0] ss:$16 sps:$4 sm:$0xff]   ;;  %v809_v2 = vld [vmem:[#allocation7 + $0x1c8] ss:$16 sps:$4 sm:$0xff]   ;;  %v810_v3 = vld [vmem:[#allocation7 + $0x1e4] ss:$16 sps:$4 sm:$0xff]  }
  0x4d   :  { %467 = vmatpush1.bf16.msra.mxu0 %v754_v22  ;;  %510 = vmatpush1.bf16.msra.mxu1 %v755_v23  ;;  %v812_v4 = vld [vmem:[#allocation7 + $0x1ec] ss:$16 sps:$4 sm:$0xff]   ;;  %v814_v5 = vld [vmem:[#allocation7 + $0x1e0] ss:$16 sps:$4 sm:$0xff]   ;;  %v815_v6 = vld [vmem:[#allocation7 + $0x1e8] ss:$16 sps:$4 sm:$0xff]  }
  0x4e   :  { %468 = vmatprep.subr.bf16.mxu0 %v756_v24  ;;  %511 = vmatprep.subr.bf16.mxu1 %v758_v25  ;;  %s894_s25 = scalar_lea.vmem %s635_s23, 128 }
  0x4f   :  { %488 = vmatprep.mubr.bf16.mxu0 %v645_v56  ;;  %531 = vmatprep.mubr.bf16.mxu1 %v645_v56  ;;  %p895_p10 = scmp.ne.s32.totalorder %s635_s23, %s894_s25  ;;  %p900_p12 = scmp.lt.s32.totalorder %s894_s25, %s894_s25 }
  0x51   :  { %469 = vmatpush1.bf16.msra.mxu0 %v760_v26  ;;  %512 = vmatpush1.bf16.msra.mxu1 %v761_v27  ;;  %p901_p13 = por %p900_p12, %p899_p11 }
  0x52   :  { %470 = vmatprep.subr.bf16.mxu0 %v762_v28  ;;  %513 = vmatprep.subr.bf16.mxu1 %v764_v29 }
  0x53   :  { %p902_p0 = pnand %p901_p13, %p895_p10 }
  0x55   :  { %471 = vmatpush1.bf16.msra.mxu0 %v766_v30  ;;  %514 = vmatpush1.bf16.msra.mxu1 %v767_v31 }
  0x56   :  { %472 = vmatprep.subr.bf16.mxu0 %v768_v32  ;;  %515 = vmatprep.subr.bf16.mxu1 %v770_v33 }
  0x59   :  { %473 = vmatpush1.bf16.msra.mxu0 %v772_v34  ;;  %516 = vmatpush1.bf16.msra.mxu1 %v773_v35 }
  0x5a   :  { %474 = vmatprep.subr.bf16.mxu0 %v774_v36  ;;  %517 = vmatprep.subr.bf16.mxu1 %v776_v37 }
  0x5d   :  { %475 = vmatpush1.bf16.msra.mxu0 %v778_v38  ;;  %518 = vmatpush1.bf16.msra.mxu1 %v779_v39 }
  0x5e   :  { %476 = vmatprep.subr.bf16.mxu0 %v780_v40  ;;  %519 = vmatprep.subr.bf16.mxu1 %v782_v41 }
  0x61   :  { %477 = vmatpush1.bf16.msra.mxu0 %v784_v42  ;;  %520 = vmatpush1.bf16.msra.mxu1 %v785_v43 }
  0x62   :  { %478 = vmatprep.subr.bf16.mxu0 %v786_v44  ;;  %521 = vmatprep.subr.bf16.mxu1 %v788_v45 }
  0x65   :  { %479 = vmatpush1.bf16.msra.mxu0 %v790_v50  ;;  %522 = vmatpush1.bf16.msra.mxu1 %v791_v51 }
  0x66   :  { %480 = vmatprep.subr.bf16.mxu0 %v792_v54  ;;  %523 = vmatprep.subr.bf16.mxu1 %v794_v55 }
  0x69   :  { %481 = vmatpush1.bf16.msra.mxu0 %v796_v57  ;;  %524 = vmatpush1.bf16.msra.mxu1 %v797_v58 }
  0x6a   :  { %482 = vmatprep.subr.bf16.mxu0 %v798_v59  ;;  %525 = vmatprep.subr.bf16.mxu1 %v800_v60 }
  0x6d   :  { %483 = vmatpush1.bf16.msra.mxu0 %v802_v61  ;;  %526 = vmatpush1.bf16.msra.mxu1 %v803_v62 }
  0x6e   :  { %484 = vmatprep.subr.bf16.mxu0 %v804_v63  ;;  %527 = vmatprep.subr.bf16.mxu1 %v806_v0 }
  0x71   :  { %485 = vmatpush1.bf16.msra.mxu0 %v808_v1  ;;  %528 = vmatpush1.bf16.msra.mxu1 %v809_v2 }
  0x72   :  { %486 = vmatprep.subr.bf16.mxu0 %v810_v3  ;;  %529 = vmatprep.subr.bf16.mxu1 %v812_v4 }
  0x75   :  { %487 = vmatpush1.bf16.msra.mxu0 %v814_v5  ;;  %530 = vmatpush1.bf16.msra.mxu1 %v815_v6 }
  0x78   :  { %489 = vmatmul.mubr.bf16.vlgmr.msra.gmra.mrb[0].mxu0 %v644_v7  ;;  %532 = vmatmul.mubr.bf16.vlgmr.msra.gmra.mrb[0].mxu1 %v644_v7 }
 0x14b   :  { %v490_v8 = vpop.f32.mrb[0].mxu0  ;;  %v533_v9 = vpop.f32.mrb[0].mxu1 }
 0x14c   :  { %v542_v10 = vmul.f32 %v490_v8, %v490_v8  ;;  %v546_v11 = vmul.f32 %v533_v9, %v533_v9  ;;  %v492_v12 = vpop.f32.mrb[1].mxu0  ;;  %v535_v13 = vpop.f32.mrb[1].mxu1 }
 0x14d   :  { %v543_v14 = vmul.f32 %v492_v12, %v492_v12  ;;  %v547_v15 = vmul.f32 %v535_v13, %v535_v13  ;;  %v494_v16 = vpop.f32.mrb[2].mxu0  ;;  %v537_v17 = vpop.f32.mrb[2].mxu1 }
 0x14e   :  { %v993_v18 = vadd.f32 %v546_v11, %v542_v10  ;;  %v544_v19 = vmul.f32 %v494_v16, %v494_v16  ;;  %v548_v20 = vmul.f32 %v537_v17, %v537_v17  ;;  %v496_v21 = vpop.f32.mrb[3].mxu0  ;;  %v539_v22 = vpop.f32.mrb[3].mxu1 }
 0x14f   :  { %v995_v23 = vadd.f32 %v547_v15, %v543_v14  ;;  %v545_v24 = vmul.f32 %v496_v21, %v496_v21  ;;  %v549_v25 = vmul.f32 %v539_v22, %v539_v22 }
 0x150   :  { %v997_v26 = vadd.f32 %v548_v20, %v544_v19  ;;  %816 = vrsqrt.f32 %v993_v18  ;;  %vm556_vm0 = vcmp.eq.f32.partialorder %v993_v18, inf  ;;  %vm558_vm1 = vcmp.eq.f32.partialorder %v993_v18, 0.0 }
 0x151   :  { %v1000_v27 = vadd.f32 %v549_v25, %v545_v24  ;;  %818 = vrsqrt.f32 %v995_v23  ;;  %v559_v32 = vand.u32 2147483648, %v993_v18  ;;  %vm563_vm2 = vcmp.eq.f32.partialorder %v995_v23, inf }
 0x152   :  { %820 = vrsqrt.f32 %v997_v26  ;;  %vm565_vm3 = vcmp.eq.f32.partialorder %v995_v23, 0.0  ;;  %v566_v36 = vand.u32 2147483648, %v995_v23  ;;  %vm570_vm4 = vcmp.eq.f32.partialorder %v997_v26, inf }
 0x153   :  { %822 = vrsqrt.f32 %v1000_v27  ;;  %v573_v40 = vand.u32 2147483648, %v997_v26  ;;  %vm577_vm5 = vcmp.eq.f32.partialorder %v1000_v27, inf  ;;  %v580_v44 = vand.u32 2147483648, %v1000_v27 }
 0x154   :  { %vm572_vm6 = vcmp.eq.f32.partialorder %v997_v26, 0.0  ;;  %vm579_vm7 = vcmp.eq.f32.partialorder %v1000_v27, 0.0 }
 0x15a   :  { %v817_v28 = vpop.eup %816 }
 0x15b   :  { %v819_v29 = vpop.eup %818  ;;  %v555_v30 = vmul.f32 %v817_v28, %v993_v18 }
 0x15c   :  { %v821_v31 = vpop.eup %820  ;;  %v562_v33 = vmul.f32 %v819_v29, %v995_v23 }
 0x15d   :  { %v823_v34 = vpop.eup %822  ;;  %v557_v35 = vsel %vm556_vm0, %v993_v18, %v555_v30  ;;  %v569_v37 = vmul.f32 %v821_v31, %v997_v26 }
 0x15e   :  { %v560_v38 = vsel %vm558_vm1, %v559_v32, %v557_v35  ;;  %v564_v39 = vsel %vm563_vm2, %v995_v23, %v562_v33  ;;  %v576_v41 = vmul.f32 %v823_v34, %v1000_v27 }
 0x15f   :  { %v567_v42 = vsel %vm565_vm3, %v566_v36, %v564_v39  ;;  %v571_v43 = vsel %vm570_vm4, %v997_v26, %v569_v37 }
 0x160   :  { %v582_v45 = vmax.f32 %v560_v38, %v567_v42  ;;  %v578_v46 = vsel %vm577_vm5, %v1000_v27, %v576_v41  ;;  %v574_v47 = vsel %vm572_vm6, %v573_v40, %v571_v43 }
 0x161   :  { %v581_v48 = vsel %vm579_vm7, %v580_v44, %v578_v46 }
 0x162   :  { %583 = vmax.xlane.f32.xlu0 %v582_v45  ;;  %v585_v49 = vmax.f32 %v574_v47, %v581_v48 }
 0x166   :  { %586 = vmax.xlane.f32.xlu0 %v585_v49 }
 0x1ef   :  { %v584_v50 = vpop.xlane.xlu0 %583 }
 0x1f0   :  { %824 = vrcp.f32 %v584_v50 }
 0x1f3   :  { %v587_v51 = vpop.xlane.xlu0 %586 }
 0x1f4   :  { %826 = vrcp.f32 %v587_v51 }
 0x1fa   :  { %v825_v52 = vpop.eup %824 }
 0x1fb   :  { %v590_v53 = vmul.f32 %v825_v52, %v560_v38  ;;  %v591_v54 = vmul.f32 %v825_v52, %v567_v42 }
 0x1fd   :  { %vm594_vm8 = vcmp.ne.f32.partialorder %v590_v53, %v590_v53  ;;  %vm595_vm9 = vcmp.ne.f32.partialorder %v591_v54, %v591_v54 }
 0x1fe   :  { %v827_v55 = vpop.eup %826  ;;  %v598_v56 = vsel %vm594_vm8, 0.0, %v590_v53  ;;  %v599_v57 = vsel %vm595_vm9, 0.0, %v591_v54 }
 0x1ff   :  { %v592_v58 = vmul.f32 %v827_v55, %v574_v47  ;;  %v593_v59 = vmul.f32 %v827_v55, %v581_v48  ;;  %v602_v60 = vmax.f32 %v598_v56, 0.0  ;;  %v603_v61 = vmax.f32 %v599_v57, 0.0 }
 0x201   :  { %vm596_vm10 = vcmp.ne.f32.partialorder %v592_v58, %v592_v58  ;;  %vm597_vm11 = vcmp.ne.f32.partialorder %v593_v59, %v593_v59  ;;  %v606_v62 = vmin.f32 %v602_v60, 1.0  ;;  %v607_v63 = vmin.f32 %v603_v61, 1.0 }
 0x202   :  { %v600_v0 = vsel %vm596_vm10, 0.0, %v592_v58  ;;  %v601_v1 = vsel %vm597_vm11, 0.0, %v593_v59 }
 0x203   :  { %v604_v2 = vmax.f32 %v600_v0, 0.0  ;;  %v605_v3 = vmax.f32 %v601_v1, 0.0  ;;  %v610_v4 = vmul.f32 %v606_v62, %v993_v18  ;;  %v611_v5 = vmul.f32 %v607_v63, %v995_v23 }
 0x205   :  { %v608_v6 = vmin.f32 %v604_v2, 1.0  ;;  %v609_v7 = vmin.f32 %v605_v3, 1.0  ;;  %v614_v9 = vadd.f32 %v611_v5, %v610_v4 }
 0x207   :  { %v612_v8 = vmul.f32 %v608_v6, %v997_v26  ;;  %v613_v10 = vmul.f32 %v609_v7, %v1000_v27 }
 0x209   :  { %v615_v11 = vadd.f32 %v614_v9, %v612_v8 }
 0x20b   :  { %v616_v12 = vadd.f32 %v615_v11, %v613_v10 }
 0x20d   :  { %617 = vadd.xlane.f32.xlu1 %v616_v12 }
 0x29a   :  { %v618_v13 = vpop.xlane.xlu1 %617 }
 0x29b   :  { %v619_v14 = vrot.slane %v618_v13, 4 }
 0x29d   :  { %v620_v15 = vadd.f32 %v619_v14, %v618_v13 }
 0x29f   :  { %v621_v16 = vrot.slane %v620_v15, 2 }
 0x2a1   :  { %v622_v17 = vadd.f32 %v621_v16, %v620_v15 }
 0x2a3   :  { %v623_v19 = vrot.slane %v622_v17, 1 }
 0x2a5   :  { %v624_v20 = vadd.f32 %v623_v19, %v622_v17 }
 0x2a7   :  { %710 = vpush %v624_v20 }
 0x2d8   :  { %s711_s24 = spop %710 }
 0x2d9   :  { %v626_v18 = vstv %s711_s24 }
 0x2da   :  { %627 = vst [vmem:[#allocation8] sm:$0xff] %v626_v18 }
 0x2db   :  { %905 = shalt.err (!%p902_p0)
}
 0x2dc   :  { %s906_s28 = scalar_lea.hbm %s1044_s3, 128 }
 0x2dd   :  { %p907_p1 = scmp.ne.s32.totalorder %s1044_s3, %s906_s28  ;;  %p910_p2 = scmp.lt.u32.totalorder %s906_s28, %s1044_s3 }
 0x2df   :  { %p912_p3 = pnand %p910_p2, %p907_p1 }
 0x2e1   :  { %915 = shalt.err (!%p912_p3)
}
 0x2e2   :  { %637 = dma.vmem_to_hbm [thread:$0]  %s635_s23, 128, %s1044_s3, [#allocation4]  }
 0x2e3   :  { %920 = dma.done.wait [#allocation4], 128  }
 0x2e4   :  { %921 = vsyncadd [#allocation4], 4294967168 }
 0x2e5   :  { %641 = vsyncpa [#allocation3], 1 }
 0x2e6   :  { %642 = vsyncpa [#allocation6], 1 }
 0x2e7   :  { %643 = vsyncpa [#allocation4], 1 }

</bundles_post_ra>
